<compile_context>
chip_gen: v7x
topology: tpu7x:2x2x1
jax: 0.10.0
libtpu: 0.0.40
codegen_flags: <defaults>
</compile_context>

<pallas_src>
import functools
import math

import jax
import jax.numpy as jnp
from jax.experimental import pallas as pl
from jax.experimental.pallas import tpu as pltpu


def _activate(v, activation, n_out):
    """Elementwise activation; `activation` is a static Python string.

    v: (TB, Tp, n_pad) with the real channels in lanes [0, n_out).  PyTorch's
    softmax(dim=1) is over the channel axis, which is the last axis here; the
    padded lanes are masked to -1e30 so the normalization only covers real
    channels.
    """
    if activation == "linear":
        return v
    if activation == "relu":
        return jnp.maximum(v, 0.0)
    if activation == "sigmoid":
        return jax.nn.sigmoid(v)
    if activation == "softmax":
        lane = jax.lax.broadcasted_iota(jnp.int32, v.shape, v.ndim - 1)
        v = jnp.where(lane < n_out, v, -1e30)
        return jax.nn.softmax(v, axis=-1)
    raise ValueError(f"unknown activation: {activation}")


def attention_kernel(x_ref, w_ref, b_ref, out_ref, *,
                     n_out, n_pad, t_valid, t_pad,
                     att_activation, cla_activation):
    # x_ref:   (TB*Tp, n_in)    channels-last rows, lane-dense (bf16 or f32)
    # w_ref:   (n_in, 2*n_pad)  fused [att | cla] 1x1-conv weights, halves 128-aligned
    # b_ref:   (1, 2*n_pad)     fused biases (f32)
    # out_ref: (TB, n_out)      pooled output (f32)
    rows = x_ref.shape[0]
    tb = rows // t_pad

    # One MXU matmul for both 1x1 convs; f32 accumulate + f32 epilogue.
    y = jnp.dot(x_ref[...], w_ref[...],
                preferred_element_type=jnp.float32) + b_ref[...]      # (rows, 2*n_pad)
    y = y.reshape(tb, t_pad, 2 * n_pad)       # layout-free: t_pad % 8 == 0

    att = _activate(y[:, :, :n_pad], att_activation, n_out)           # (tb, Tp, n_pad)
    cla = _activate(y[:, :, n_pad:], cla_activation, n_out)

    eps = 1e-07
    att = jnp.clip(att, eps, 1.0 - eps)

    if t_valid != t_pad:        # static: only when T was padded up to a multiple of 8
        t_idx = jax.lax.broadcasted_iota(jnp.int32, att.shape, 1)
        att = jnp.where(t_idx < t_valid, att, 0.0)

    # Normalize attention over time (axis=1) and attention-pool cla.
    denom = jnp.sum(att, axis=1, keepdims=True)                       # (tb, 1, n_pad)
    inv = pl.reciprocal(denom, approx=True)                           # EUP slot
    inv = inv * (2.0 - denom * inv)                                   # Newton step 1
    inv = inv * (2.0 - denom * inv)                                   # Newton step 2 (~f32 exact)
    pooled = jnp.sum(att * inv * cla, axis=1)                         # (tb, n_pad)

    out_ref[...] = pooled[:, :n_out].astype(out_ref.dtype)


def _num_tensorcores_per_chip():
    """Perf heuristic only: v7x packs 2 TensorCores per chip, v5e/v6e have 1."""
    try:
        kind = jax.devices()[0].device_kind.lower()
    except Exception:
        return 1
    return 2 if "v7" in kind else 1


def _pick_batch_tile(B, t_pad, n_in, n_pad, n_out, x_itemsize, w_itemsize,
                     target_rows=4096, vmem_budget=20 << 20):
    """Pick TB (batch elements per grid step).

    TB divides B and is a multiple of 8 (sublane tiling of the (TB, n_out)
    output block) or equals B.  Sized so the actual per-step VMEM footprint
    (double-buffered bf16 x tile + resident weights + f32 intermediates) stays
    within `vmem_budget` (v7x has only 64 MiB physical VMEM), aiming for
    M = TB*Tp >= target_rows so the MXU streams and the ~0.35us/step grid
    overhead is amortized.  Only 2-TensorCore chips (v7x) are forced to keep
    >= 2 grid steps so the "parallel" batch axis can be sharded across cores;
    on single-TC v5e/v6e extra steps are pure overhead.
    """
    resident = 2 * (n_in * 2 * n_pad * w_itemsize) + 2 * (2 * n_pad * 4)

    def step_bytes(tb):
        rows = tb * t_pad
        x_tile = rows * n_in * x_itemsize          # one x buffer
        y_f32 = rows * 2 * n_pad * 4               # f32 matmul output
        out_tile = tb * n_out * 4
        # 2x double-buffering on x/out, ~3x slack for f32 intermediates.
        return 2 * x_tile + 2 * out_tile + 3 * y_f32

    cands = [tb for tb in range(8, B + 1, 8) if B % tb == 0]
    if B not in cands:
        cands.append(B)
    cands = sorted(set(cands))

    tb = cands[0]
    for c in cands:
        if resident + step_bytes(c) > vmem_budget:
            break
        tb = c
        if c * t_pad >= target_rows:
            break

    if _num_tensorcores_per_chip() >= 2 and B // tb < 2:
        smaller = [c for c in cands if B // c >= 2]
        if smaller:
            tb = smaller[-1]
    return tb


def attention_forward(x_nchw, w_att, b_att, w_cla, b_cla,
                      att_activation="sigmoid", cla_activation="sigmoid",
                      compute_dtype=jnp.bfloat16):
    """x_nchw: (B, n_in, T, 1) float32 — same layout as the PyTorch module.
    Returns (B, n_out) float32."""
    B, n_in, T, _ = x_nchw.shape
    n_out = w_att.shape[0]
    n_pad = ((n_out + 127) // 128) * 128           # 128-lane-aligned att/cla halves
    t_pad = ((T + 7) // 8) * 8                     # sublane-aligned time axis

    # Channels-last, lane-dense x: one fused XLA transpose(+pad+cast) pass.
    x_cl = jnp.transpose(jnp.squeeze(x_nchw, axis=-1), (0, 2, 1))     # (B, T, n_in)
    if t_pad != T:
        x_cl = jnp.pad(x_cl, ((0, 0), (0, t_pad - T), (0, 0)))
    x_mat = x_cl.reshape(B * t_pad, n_in).astype(compute_dtype)       # (B*Tp, n_in)

    # Fused [att | cla] weights; each half starts on a 128-lane boundary so the
    # in-kernel split is a vreg-aligned slice (no lane rotates).
    w_att2 = jnp.transpose(w_att.reshape(n_out, n_in))                # (n_in, n_out)
    w_cla2 = jnp.transpose(w_cla.reshape(n_out, n_in))
    w_fused = jnp.zeros((n_in, 2 * n_pad), compute_dtype)
    w_fused = w_fused.at[:, :n_out].set(w_att2.astype(compute_dtype))
    w_fused = w_fused.at[:, n_pad:n_pad + n_out].set(w_cla2.astype(compute_dtype))
    b_fused = jnp.zeros((1, 2 * n_pad), jnp.float32)
    b_fused = b_fused.at[0, :n_out].set(b_att)
    b_fused = b_fused.at[0, n_pad:n_pad + n_out].set(b_cla)

    x_bytes = jnp.dtype(compute_dtype).itemsize
    TB = _pick_batch_tile(B, t_pad, n_in, n_pad, n_out, x_bytes, x_bytes)
    grid_steps = B // TB

    kernel = functools.partial(
        attention_kernel, n_out=n_out, n_pad=n_pad, t_valid=T, t_pad=t_pad,
        att_activation=att_activation, cla_activation=cla_activation)

    x_spec_kwargs = {}
    if grid_steps >= 4:
        # Hide DMA issue latency when per-step compute is only a few hundred cycles.
        x_spec_kwargs["pipeline_mode"] = pl.Buffered(3)

    cost = pl.CostEstimate(
        flops=2 * B * t_pad * n_in * 2 * n_pad + 8 * B * t_pad * 2 * n_pad,
        transcendentals=2 * B * t_pad * n_pad + B * n_pad,
        bytes_accessed=(x_mat.size * x_bytes + w_fused.size * x_bytes
                        + b_fused.size * 4 + B * n_out * 4),
    )

    out = pl.pallas_call(
        kernel,
        out_shape=jax.ShapeDtypeStruct((B, n_out), jnp.float32),
        grid=(grid_steps,),
        in_specs=[
            pl.BlockSpec((TB * t_pad, n_in), lambda b: (b, 0), **x_spec_kwargs),
            pl.BlockSpec((n_in, 2 * n_pad), lambda b: (0, 0)),
            pl.BlockSpec((1, 2 * n_pad), lambda b: (0, 0)),
        ],
        out_specs=pl.BlockSpec((TB, n_out), lambda b: (b, 0)),
        compiler_params=pltpu.CompilerParams(
            dimension_semantics=("parallel",),
            vmem_limit_bytes=48 << 20,
        ),
        cost_estimate=cost,
    )(x_mat, w_fused, b_fused)

    return out                                                        # (B, n_out)


attention_forward_jit = jax.jit(
    attention_forward,
    static_argnames=("att_activation", "cla_activation", "compute_dtype"))


def init_conv1x1_params(key, n_out, n_in):
    """Deterministic replica of `init_layer` for a 1x1 Conv2d."""
    n = n_in * 1 * 1
    std = math.sqrt(2.0 / n)
    scale = std * math.sqrt(3.0)
    w = jax.random.uniform(key, (n_out, n_in, 1, 1),
                           minval=-scale, maxval=scale, dtype=jnp.float32)
    b = jnp.zeros((n_out,), jnp.float32)
    return w, b


def _reference(x_nchw, w_att, b_att, w_cla, b_cla, att_activation, cla_activation):
    """Pure-JAX reference matching the PyTorch forward (for verification)."""
    n_out, n_in = w_att.shape[0], w_att.shape[1]
    x2 = x_nchw[:, :, :, 0]                                           # (B, n_in, T)
    hi = jax.lax.Precision.HIGHEST

    def act(v, a):  # v: (B, n_out, T)
        if a == "linear":
            return v
        if a == "relu":
            return jnp.maximum(v, 0.0)
        if a == "sigmoid":
            return jax.nn.sigmoid(v)
        if a == "softmax":
            return jax.nn.softmax(v, axis=1)
        raise ValueError(a)

    att = jnp.einsum("oc,bct->bot", w_att.reshape(n_out, n_in), x2,
                     precision=hi) + b_att[None, :, None]
    cla = jnp.einsum("oc,bct->bot", w_cla.reshape(n_out, n_in), x2,
                     precision=hi) + b_cla[None, :, None]
    att = act(att, att_activation)
    cla = act(cla, cla_activation)
    eps = 1e-07
    att = jnp.clip(att, eps, 1.0 - eps)
    norm_att = att / jnp.sum(att, axis=2)[:, :, None]
    return jnp.sum(norm_att * cla, axis=2)                            # (B, n_out)


if __name__ == "__main__":
    key = jax.random.PRNGKey(0)

    configs = [
        # (B, n_in, T, n_out, att_act, cla_act, compute_dtype, tol)
        (16, 32, 8, 16, "sigmoid", "sigmoid", jnp.float32, 2e-4),    # exact-path check
        (16, 32, 8, 16, "sigmoid", "sigmoid", jnp.bfloat16, 2.5e-2),  # perf-path check
        (8, 24, 12, 8, "softmax", "relu", jnp.float32, 2e-4),         # T-pad + channel-softmax mask
    ]

    for idx, (B, n_in, T, n_out, att_act, cla_act, dtype, tol) in enumerate(configs):
        k_x, k_att, k_cla, key = jax.random.split(key, 4)
        x = jax.random.normal(k_x, (B, n_in, T, 1), dtype=jnp.float32)
        w_att, b_att = init_conv1x1_params(k_att, n_out, n_in)
        w_cla, b_cla = init_conv1x1_params(k_cla, n_out, n_in)

        out = attention_forward_jit(x, w_att, b_att, w_cla, b_cla,
                                    att_activation=att_act,
                                    cla_activation=cla_act,
                                    compute_dtype=dtype)
        out = jax.block_until_ready(out)

        ref = _reference(x, w_att, b_att, w_cla, b_cla, att_act, cla_act)
        assert out.shape == (B, n_out)
        assert jnp.allclose(out, ref, atol=tol, rtol=tol), (
            f"config {idx}: kernel/reference mismatch "
            f"(max abs err {jnp.max(jnp.abs(out - ref)):.3e})")

    print("KERNEL_OK")
</pallas_src>

<mosaic_0001>
module attributes {stable_mosaic.version = 11 : i64} {
  func.func @attention_kernel(%arg0: i32, %arg1: memref<128x32xf32, #tpu.memory_space<vmem>>, %arg2: memref<32x256xf32, #tpu.memory_space<vmem>>, %arg3: memref<1x256xf32, #tpu.memory_space<vmem>>, %arg4: memref<16x16xf32, #tpu.memory_space<vmem>>) attributes {dimension_semantics = [#tpu.dimension_semantics<parallel>], iteration_bounds = array<i64: 1>, scalar_prefetch = 0 : i64, scratch_operands = 0 : i64, tpu.core_type = #tpu.core_type<tc>, window_params = [{transform_indices = @transform_0, window_bounds = array<i64: 128, 32>}, {pipeline_mode = #tpu.pipeline_mode<synchronous>, transform_indices = @transform_1, window_bounds = array<i64: 32, 256>}, {pipeline_mode = #tpu.pipeline_mode<synchronous>, transform_indices = @transform_2, window_bounds = array<i64: 1, 256>}, {transform_indices = @transform_3, window_bounds = array<i64: 16, 16>}]} {
    %c0 = arith.constant 0 : index
    %c0_0 = arith.constant 0 : index
    %0 = vector.load %arg1[%c0, %c0_0] : memref<128x32xf32, #tpu.memory_space<vmem>>, vector<128x32xf32>
    %c0_1 = arith.constant 0 : index
    %c0_2 = arith.constant 0 : index
    %1 = vector.load %arg2[%c0_1, %c0_2] : memref<32x256xf32, #tpu.memory_space<vmem>>, vector<32x256xf32>
    %cst = arith.constant dense<0.000000e+00> : vector<128x256xf32>
    %2 = tpu.matmul %0, %1, %cst {dimension_numbers = #tpu.dot_dimension_numbers<[1], [0], [0], [1], [0, 0, 1, 1], [], []>} : vector<128x32xf32>, vector<32x256xf32>, vector<128x256xf32> -> vector<128x256xf32>
    %c0_3 = arith.constant 0 : index
    %c0_4 = arith.constant 0 : index
    %3 = vector.load %arg3[%c0_3, %c0_4] : memref<1x256xf32, #tpu.memory_space<vmem>>, vector<1x256xf32>
    %4 = vector.broadcast %3 : vector<1x256xf32> to vector<128x256xf32>
    %5 = arith.addf %2, %4 : vector<128x256xf32>
    %6 = vector.shape_cast %5 : vector<128x256xf32> to vector<16x8x256xf32>
    %7 = vector.extract_strided_slice %6 {offsets = [0, 0, 0], sizes = [16, 8, 128], strides = [1, 1, 1]} : vector<16x8x256xf32> to vector<16x8x128xf32>
    %8 = arith.negf %7 : vector<16x8x128xf32>
    %9 = math.exp %8 : vector<16x8x128xf32>
    %cst_5 = arith.constant 1.000000e+00 : f32
    %10 = vector.broadcast %cst_5 : f32 to vector<16x8x128xf32>
    %11 = arith.addf %10, %9 : vector<16x8x128xf32>
    %12 = arith.divf %10, %11 : vector<16x8x128xf32>
    %13 = vector.extract_strided_slice %6 {offsets = [0, 0, 128], sizes = [16, 8, 128], strides = [1, 1, 1]} : vector<16x8x256xf32> to vector<16x8x128xf32>
    %14 = arith.negf %13 : vector<16x8x128xf32>
    %15 = math.exp %14 : vector<16x8x128xf32>
    %cst_6 = arith.constant 1.000000e+00 : f32
    %16 = vector.broadcast %cst_6 : f32 to vector<16x8x128xf32>
    %17 = arith.addf %16, %15 : vector<16x8x128xf32>
    %18 = arith.divf %16, %17 : vector<16x8x128xf32>
    %cst_7 = arith.constant 1.000000e-07 : f32
    %cst_8 = arith.constant 0.99999988 : f32
    %19 = vector.broadcast %cst_7 : f32 to vector<16x8x128xf32>
    %20 = arith.maximumf %19, %12 : vector<16x8x128xf32>
    %21 = vector.broadcast %cst_8 : f32 to vector<16x8x128xf32>
    %22 = arith.minimumf %21, %20 : vector<16x8x128xf32>
    %cst_9 = arith.constant dense<0.000000e+00> : vector<16x128xf32>
    %23 = vector.multi_reduction <add>, %22, %cst_9 [1] : vector<16x8x128xf32> to vector<16x128xf32>
    %24 = vector.shape_cast %23 : vector<16x128xf32> to vector<16x1x128xf32>
    %25 = tpu.reciprocal %24 {approx = true} : vector<16x1x128xf32> -> vector<16x1x128xf32>
    %26 = arith.mulf %24, %25 : vector<16x1x128xf32>
    %cst_10 = arith.constant 2.000000e+00 : f32
    %27 = vector.broadcast %cst_10 : f32 to vector<16x1x128xf32>
    %28 = arith.subf %27, %26 : vector<16x1x128xf32>
    %29 = arith.mulf %25, %28 : vector<16x1x128xf32>
    %30 = arith.mulf %24, %29 : vector<16x1x128xf32>
    %cst_11 = arith.constant 2.000000e+00 : f32
    %31 = vector.broadcast %cst_11 : f32 to vector<16x1x128xf32>
    %32 = arith.subf %31, %30 : vector<16x1x128xf32>
    %33 = arith.mulf %29, %32 : vector<16x1x128xf32>
    %34 = vector.broadcast %33 : vector<16x1x128xf32> to vector<16x8x128xf32>
    %35 = arith.mulf %22, %34 : vector<16x8x128xf32>
    %36 = arith.mulf %35, %18 : vector<16x8x128xf32>
    %cst_12 = arith.constant dense<0.000000e+00> : vector<16x128xf32>
    %37 = vector.multi_reduction <add>, %36, %cst_12 [1] : vector<16x8x128xf32> to vector<16x128xf32>
    %38 = vector.extract_strided_slice %37 {offsets = [0, 0], sizes = [16, 16], strides = [1, 1]} : vector<16x128xf32> to vector<16x16xf32>
    %c0_13 = arith.constant 0 : index
    %c0_14 = arith.constant 0 : index
    %39 = vector.load %arg4[%c0_13, %c0_14] : memref<16x16xf32, #tpu.memory_space<vmem>>, vector<16x16xf32>
    tpu.vector_store %arg4[%c0_13, %c0_14], %38 {strides = array<i32>} : memref<16x16xf32, #tpu.memory_space<vmem>>, vector<16x16xf32>,
    return
  }
  func.func @transform_0(%arg0: i32) -> (i32, i32) {
    %c0_i32 = arith.constant 0 : i32
    %c0_i32_0 = arith.constant 0 : i32
    return %arg0, %c0_i32 : i32, i32
  }
  func.func @transform_1(%arg0: i32) -> (i32, i32) {
    %c0_i32 = arith.constant 0 : i32
    %c0_i32_0 = arith.constant 0 : i32
    %c0_i32_1 = arith.constant 0 : i32
    return %c0_i32, %c0_i32_0 : i32, i32
  }
  func.func @transform_2(%arg0: i32) -> (i32, i32) {
    %c0_i32 = arith.constant 0 : i32
    %c0_i32_0 = arith.constant 0 : i32
    %c0_i32_1 = arith.constant 0 : i32
    return %c0_i32, %c0_i32_0 : i32, i32
  }
  func.func @transform_3(%arg0: i32) -> (i32, i32) {
    %c0_i32 = arith.constant 0 : i32
    %c0_i32_0 = arith.constant 0 : i32
    return %arg0, %c0_i32 : i32, i32
  }
}

</mosaic_0001>

<bundles_post_ra>
// kernel: attention_forward.1
= control target key start
LH: loop header
LB: loop body
LE: loop exit
PB: predicated region body
PF: predicated region fallthrough
CT: control target
= control target key end

     0   :  { %v1127_v7 = vmov 0.0   ;;  %vm51_vm0 = vcmask 261120   ;;  %s1550_s0 = inlined_call_operand.vmem [shape: f32[128,32], index: 0, kind: input, shape index: {}]   ;;  %s1551_s1 = inlined_call_operand.vmem [shape: f32[32,256], index: 1, kind: input, shape index: {}]   ;;  %s1552_s2 = inlined_call_operand.vmem [shape: f32[1,256], index: 2, kind: input, shape index: {}]   ;;  %s1553_s3 = inlined_call_operand.hbm [shape: f32[16,16], index: 3, kind: output, shape index: {}]  }
   0x1   :  { %v32_v0 = vld [vmem:[%s1551_s1 + $0x8] sm:$0xff]  ;;  %v34_v1 = vld [vmem:[%s1551_s1 + $0x18] sm:$0xff]  ;;  %v31_v2 = vld [vmem:[%s1551_s1] sm:$0xff]  ;;  %164 = vmatprep.mubr.f32.mxu0 %v1127_v7  ;;  %212 = vmatprep.mubr.f32.mxu1 %v1127_v7 }
   0x2   :  { %v927_v3 = vpack.c.bf16 %v34_v1, %v32_v0  ;;  %v33_v4 = vld [vmem:[%s1551_s1 + $0x10] sm:$0xff]  ;;  %v36_v5 = vld [vmem:[%s1551_s1 + $0x28] sm:$0xff]  ;;  %v38_v6 = vld [vmem:[%s1551_s1 + $0x38] sm:$0xff] }
   0x3   :  { %v929_v8 = vpack.c.bf16 %v33_v4, %v31_v2  ;;  %v931_v9 = vpack.c.bf16 %v38_v6, %v36_v5  ;;  %v35_v10 = vld [vmem:[%s1551_s1 + $0x20] sm:$0xff]  ;;  %v37_v11 = vld [vmem:[%s1551_s1 + $0x30] sm:$0xff] }
   0x4   :  { %928 = vmatprep.subr.bf16.mxu0 %v927_v3  ;;  %935 = vmatprep.subr.bf16.mxu1 %v927_v3  ;;  %v933_v12 = vpack.c.bf16 %v37_v11, %v35_v10  ;;  %v15_v13 = vld [vmem:[%s1550_s0] sm:$0xff] }
   0x5   :  { %930 = vmatpush1.bf16.msra.mxu0 %v929_v8  ;;  %937 = vmatpush1.bf16.msra.mxu1 %v929_v8  ;;  %v23_v14 = vld [vmem:[%s1550_s0 + $0x40] sm:$0xff] }
   0x6   :  { %932 = vmatprep.subr.bf16.mxu0 %v931_v9  ;;  %936 = vmatprep.subr.bf16.mxu1 %v931_v9 }
   0x9   :  { %934 = vmatpush1.bf16.msra.mxu0 %v933_v12  ;;  %938 = vmatpush1.bf16.msra.mxu1 %v933_v12 }
   0xa   :  { %8 = vsyncpa [#allocation3], 0  ;;  %v16_v15 = vld [vmem:[%s1550_s0 + $0x8] sm:$0xff]  ;;  %v17_v17 = vld [vmem:[%s1550_s0 + $0x10] sm:$0xff]  ;;  %v41_v29 = vlaneseq  ;;  %vm837_vm1 = vcmask 1041409   ;;  %vm839_vm2 = vcmask 1042434  }
   0xb   :  { %v24_v16 = vld [vmem:[%s1550_s0 + $0x48] sm:$0xff]  ;;  %v25_v18 = vld [vmem:[%s1550_s0 + $0x50] sm:$0xff]  ;;  %v18_v19 = vld [vmem:[%s1550_s0 + $0x18] sm:$0xff]  ;;  %vm841_vm3 = vcmask 1043459   ;;  %vm843_vm4 = vcmask 1044484   ;;  %vm845_vm5 = vcmask 1045509  }
   0xc   :  { %879 = vmatmul.mubr.msk.f32.vlgmr.msra.gmra.mrb[0].mxu0 %vm51_vm0, %v15_v13  ;;  %887 = vmatmul.mubr.msk.f32.vlgmr.msra.gmra.mrb[0].mxu1 %vm51_vm0, %v23_v14  ;;  %v26_v20 = vld [vmem:[%s1550_s0 + $0x58] sm:$0xff]  ;;  %v19_v21 = vld [vmem:[%s1550_s0 + $0x20] sm:$0xff]  ;;  %v20_v23 = vld [vmem:[%s1550_s0 + $0x28] sm:$0xff]  ;;  %v42_v30 = vshrl.u32 %v41_v29, 7  ;;  %vm847_vm6 = vcmask 1046534   ;;  %vm849_vm7 = vcmask 1047559  }
   0xd   :  { %170 = vmatprep.mubr.f32.mxu0 %v1127_v7  ;;  %218 = vmatprep.mubr.f32.mxu1 %v1127_v7  ;;  %v27_v22 = vld [vmem:[%s1550_s0 + $0x60] sm:$0xff]  ;;  %v28_v24 = vld [vmem:[%s1550_s0 + $0x68] sm:$0xff]  ;;  %v21_v25 = vld [vmem:[%s1550_s0 + $0x30] sm:$0xff]  ;;  %vm860_vm8 = vcmask 130048  }
   0xe   :  { %v29_v26 = vld [vmem:[%s1550_s0 + $0x70] sm:$0xff]  ;;  %v22_v27 = vld [vmem:[%s1550_s0 + $0x38] sm:$0xff]  ;;  %v43_v31 = vsub.s32 0, %v42_v30  ;;  %v39_v32 = vld [vmem:[%s1552_s2] sm:$0x3]  ;;  %v47_v33 = vsub.s32 1, %v42_v30 }
   0xf   :  { %v30_v28 = vld [vmem:[%s1550_s0 + $0x78] sm:$0xff]  ;;  %s1128_s0 = smov [#allocation2]  }
  0x10   :  { %880 = vmatmul.mubr.msk.f32.gmra.mrb[2].mxu0 %vm51_vm0, %v16_v15  ;;  %888 = vmatmul.mubr.msk.f32.gmra.mrb[2].mxu1 %vm51_vm0, %v24_v16  ;;  %v1242_v34 = vrot.slane %v39_v32, %v43_v31  ;;  %v1244_v37 = vrot.slane %v39_v32, %v47_v33  ;;  %s868_s2 = sshll.u32 %s1128_s0, 4  ;;  %s869_s2 = int_to_ptr.vmem [resolvable:$true] %s868_s2 }
  0x11   :  { %176 = vmatprep.mubr.f32.mxu0 %v1127_v7  ;;  %224 = vmatprep.mubr.f32.mxu1 %v1127_v7  ;;  %s1103_s6 = scalar_lea.vmem %s869_s2, 256  ;;  %p1108_p1 = scmp.lt.s32.totalorder %s869_s2, %s869_s2 }
  0x12   :  { %p1104_p0 = scmp.ne.s32.totalorder %s869_s2, %s1103_s6  ;;  %p1109_p2 = scmp.lt.s32.totalorder %s1103_s6, %s1103_s6 }
  0x14   :  { %881 = vmatmul.mubr.msk.f32.gmra.mrb[4].mxu0 %vm51_vm0, %v17_v17  ;;  %889 = vmatmul.mubr.msk.f32.gmra.mrb[4].mxu1 %vm51_vm0, %v25_v18  ;;  %p1110_p3 = por %p1109_p2, %p1108_p1 }
  0x15   :  { %182 = vmatprep.mubr.f32.mxu0 %v1127_v7  ;;  %230 = vmatprep.mubr.f32.mxu1 %v1127_v7 }
  0x16   :  { %p1111_p4 = pnand %p1110_p3, %p1104_p0 }
  0x18   :  { %882 = vmatmul.mubr.msk.f32.gmra.mrb[6].mxu0 %vm51_vm0, %v18_v19  ;;  %890 = vmatmul.mubr.msk.f32.gmra.mrb[6].mxu1 %vm51_vm0, %v26_v20 }
  0x19   :  { %188 = vmatprep.mubr.f32.mxu0 %v1127_v7  ;;  %236 = vmatprep.mubr.f32.mxu1 %v1127_v7 }
  0x1c   :  { %883 = vmatmul.mubr.msk.f32.gmra.mrb[8].mxu0 %vm51_vm0, %v19_v21  ;;  %891 = vmatmul.mubr.msk.f32.gmra.mrb[8].mxu1 %vm51_vm0, %v27_v22 }
  0x1d   :  { %194 = vmatprep.mubr.f32.mxu0 %v1127_v7  ;;  %242 = vmatprep.mubr.f32.mxu1 %v1127_v7 }
  0x20   :  { %884 = vmatmul.mubr.msk.f32.gmra.mrb[10].mxu0 %vm51_vm0, %v20_v23  ;;  %892 = vmatmul.mubr.msk.f32.gmra.mrb[10].mxu1 %vm51_vm0, %v28_v24 }
  0x21   :  { %200 = vmatprep.mubr.f32.mxu0 %v1127_v7  ;;  %248 = vmatprep.mubr.f32.mxu1 %v1127_v7 }
  0x24   :  { %885 = vmatmul.mubr.msk.f32.gmra.mrb[12].mxu0 %vm51_vm0, %v21_v25  ;;  %893 = vmatmul.mubr.msk.f32.gmra.mrb[12].mxu1 %vm51_vm0, %v29_v26 }
  0x25   :  { %206 = vmatprep.mubr.f32.mxu0 %v1127_v7  ;;  %254 = vmatprep.mubr.f32.mxu1 %v1127_v7 }
  0x28   :  { %886 = vmatmul.mubr.msk.f32.gmra.mrb[14].mxu0 %vm51_vm0, %v22_v27  ;;  %894 = vmatmul.mubr.msk.f32.gmra.mrb[14].mxu1 %vm51_vm0, %v30_v28 }
  0xdf   :  { %v166_v35 = vpop.f32.mrb[0].mxu0  ;;  %v214_v36 = vpop.f32.mrb[0].mxu1 }
  0xe0   :  { %v167_v38 = vadd.f32 %v166_v35, %v1242_v34  ;;  %v215_v39 = vadd.f32 %v214_v36, %v1242_v34  ;;  %v168_v40 = vpop.f32.mrb[1].mxu0  ;;  %v216_v41 = vpop.f32.mrb[1].mxu1 }
  0xe1   :  { %v169_v44 = vadd.f32 %v168_v40, %v1244_v37  ;;  %v217_v51 = vadd.f32 %v216_v41, %v1244_v37 }
  0xe2   :  { %v895_v42 = vmul.f32 -1.442695, %v167_v38  ;;  %v903_v43 = vmul.f32 -1.442695, %v215_v39 }
  0xe3   :  { %v172_v45 = vpop.f32.mrb[2].mxu0  ;;  %v220_v46 = vpop.f32.mrb[2].mxu1  ;;  %v911_v54 = vmul.f32 -1.442695, %v169_v44  ;;  %v919_v62 = vmul.f32 -1.442695, %v217_v51 }
  0xe4   :  { %943 = vpow2.f32 %v895_v42  ;;  %v173_v47 = vadd.f32 %v172_v45, %v1242_v34  ;;  %v221_v48 = vadd.f32 %v220_v46, %v1242_v34  ;;  %v174_v49 = vpop.f32.mrb[3].mxu0  ;;  %v222_v50 = vpop.f32.mrb[3].mxu1 }
  0xe5   :  { %945 = vpow2.f32 %v903_v43  ;;  %v175_v55 = vadd.f32 %v174_v49, %v1244_v37  ;;  %v223_v13 = vadd.f32 %v222_v50, %v1244_v37 }
  0xe6   :  { %v896_v52 = vmul.f32 -1.442695, %v173_v47  ;;  %v904_v53 = vmul.f32 -1.442695, %v221_v48 }
  0xe7   :  { %v178_v56 = vpop.f32.mrb[4].mxu0  ;;  %v226_v57 = vpop.f32.mrb[4].mxu1  ;;  %v912_v1 = vmul.f32 -1.442695, %v175_v55  ;;  %v920_v23 = vmul.f32 -1.442695, %v223_v13 }
  0xe8   :  { %947 = vpow2.f32 %v896_v52  ;;  %v179_v58 = vadd.f32 %v178_v56, %v1242_v34  ;;  %v227_v59 = vadd.f32 %v226_v57, %v1242_v34  ;;  %v180_v60 = vpop.f32.mrb[5].mxu0  ;;  %v228_v61 = vpop.f32.mrb[5].mxu1 }
  0xe9   :  { %949 = vpow2.f32 %v904_v53  ;;  %v181_v20 = vadd.f32 %v180_v60, %v1244_v37  ;;  %v229_v24 = vadd.f32 %v228_v61, %v1244_v37 }
  0xea   :  { %v897_v63 = vmul.f32 -1.442695, %v179_v58  ;;  %v905_v0 = vmul.f32 -1.442695, %v227_v59  ;;  %951 = vpow2.f32 %v911_v54 }
  0xeb   :  { %v184_v2 = vpop.f32.mrb[6].mxu0  ;;  %v232_v3 = vpop.f32.mrb[6].mxu1  ;;  %v913_v33 = vmul.f32 -1.442695, %v181_v20  ;;  %v921_v41 = vmul.f32 -1.442695, %v229_v24 }
  0xec   :  { %953 = vpow2.f32 %v897_v63  ;;  %v185_v4 = vadd.f32 %v184_v2, %v1242_v34  ;;  %v186_v5 = vpop.f32.mrb[7].mxu0  ;;  %v234_v6 = vpop.f32.mrb[7].mxu1  ;;  %v233_v30 = vadd.f32 %v232_v3, %v1242_v34 }
  0xed   :  { %955 = vpow2.f32 %v905_v0  ;;  %v187_v35 = vadd.f32 %v186_v5, %v1244_v37  ;;  %v235_v36 = vadd.f32 %v234_v6, %v1244_v37 }
  0xee   :  { %v944_v7 = vpop.eup %943  ;;  %957 = vpow2.f32 %v919_v62  ;;  %v898_v8 = vmul.f32 -1.442695, %v185_v4  ;;  %v906_v47 = vmul.f32 -1.442695, %v233_v30 }
  0xef   :  { %v946_v9 = vpop.eup %945  ;;  %v309_v10 = vadd.f32 1.0, %v944_v7  ;;  %959 = vpow2.f32 %v912_v1  ;;  %v190_v11 = vpop.f32.mrb[8].mxu0  ;;  %v914_v51 = vmul.f32 -1.442695, %v187_v35  ;;  %v1275_v52 = vmul.f32 -1.442695, %v235_v36 }
  0xf0   :  { %v317_v12 = vadd.f32 1.0, %v946_v9  ;;  %961 = vpow2.f32 %v898_v8  ;;  %v238_v14 = vpop.f32.mrb[8].mxu1  ;;  %v192_v15 = vpop.f32.mrb[9].mxu0  ;;  %v191_v48 = vadd.f32 %v190_v11, %v1242_v34 }
  0xf1   :  { %963 = vrcp.f32 %v309_v10  ;;  %v240_v16 = vpop.f32.mrb[9].mxu1  ;;  %v239_v61 = vadd.f32 %v238_v14, %v1242_v34  ;;  %v193_v1 = vadd.f32 %v192_v15, %v1244_v37 }
  0xf2   :  { %v948_v17 = vpop.eup %947  ;;  %965 = vrcp.f32 %v317_v12  ;;  %v899_v0 = vmul.f32 -1.442695, %v191_v48  ;;  %v1292_v5 = vadd.f32 %v240_v16, %v1244_v37 }
  0xf3   :  { %v950_v18 = vpop.eup %949  ;;  %v310_v19 = vadd.f32 1.0, %v948_v17  ;;  %v196_v21 = vpop.f32.mrb[10].mxu0  ;;  %v907_v13 = vmul.f32 -1.442695, %v239_v61  ;;  %v1301_v16 = vmul.f32 -1.442695, %v193_v1 }
  0xf4   :  { %v318_v22 = vadd.f32 1.0, %v950_v18  ;;  %v244_v25 = vpop.f32.mrb[10].mxu1  ;;  %v1259_v26 = vpop.f32.mrb[11].mxu0  ;;  %v197_v6 = vadd.f32 %v196_v21, %v1242_v34 }
  0xf5   :  { %v952_v27 = vpop.eup %951  ;;  %967 = vrcp.f32 %v310_v19  ;;  %v1261_v28 = vpop.f32.mrb[11].mxu1  ;;  %v245_v10 = vadd.f32 %v244_v25, %v1242_v34 }
  0xf6   :  { %v954_v29 = vpop.eup %953  ;;  %969 = vrcp.f32 %v318_v22  ;;  %v405_v56 = vadd.f32 1.0, %v952_v27  ;;  %v900_v21 = vmul.f32 -1.442695, %v197_v6 }
  0xf7   :  { %v956_v31 = vpop.eup %955  ;;  %v311_v32 = vadd.f32 1.0, %v954_v29  ;;  %v1266_v38 = vpop.f32.mrb[12].mxu0  ;;  %971 = vpow2.f32 %v920_v23  ;;  %v908_v27 = vmul.f32 -1.442695, %v245_v10 }
  0xf8   :  { %v958_v39 = vpop.eup %957  ;;  %v319_v40 = vadd.f32 1.0, %v956_v31  ;;  %v1268_v42 = vpop.f32.mrb[12].mxu1 }
  0xf9   :  { %v1270_v43 = vpop.f32.mrb[13].mxu0  ;;  %v960_v44 = vpop.eup %959  ;;  %973 = vrcp.f32 %v311_v32  ;;  %v413_v60 = vadd.f32 1.0, %v958_v39 }
  0xfa   :  { %v1272_v45 = vpop.f32.mrb[13].mxu1  ;;  %v962_v46 = vpop.eup %961  ;;  %975 = vrcp.f32 %v319_v40  ;;  %v406_v4 = vadd.f32 1.0, %v960_v44 }
  0xfb   :  { %v964_v49 = vpop.eup %963  ;;  %977 = vpow2.f32 %v913_v33  ;;  %v312_v50 = vadd.f32 1.0, %v962_v46  ;;  %v1277_v53 = vpop.f32.mrb[14].mxu0 }
  0xfc   :  { %v966_v54 = vpop.eup %965  ;;  %v453_v55 = vmax.f32 %v964_v49, 1e-07  ;;  %979 = vpow2.f32 %v921_v41  ;;  %v1279_v57 = vpop.f32.mrb[14].mxu1 }
  0xfd   :  { %v1281_v58 = vpop.f32.mrb[15].mxu0  ;;  %v461_v59 = vmax.f32 %v966_v54, 1e-07  ;;  %981 = vrcp.f32 %v312_v50  ;;  %v1284_v62 = vpop.f32.mrb[15].mxu1 }
  0xfe   :  { %v1286_v63 = vmin.f32 %v453_v55, 0.9999999  ;;  %983 = vpow2.f32 %v906_v47 }
  0xff   :  { %v968_v2 = vpop.eup %967  ;;  %v1289_v3 = vmin.f32 %v461_v59, 0.9999999  ;;  %985 = vrcp.f32 %v405_v56 }
 0x100   :  { %v970_v7 = vpop.eup %969  ;;  %v485_v8 = vrot.slane %v1286_v63, 4  ;;  %v454_v9 = vmax.f32 %v968_v2, 1e-07  ;;  %987 = vrcp.f32 %v413_v60 }
 0x101   :  { %v533_v11 = vrot.slane %v1289_v3, 4  ;;  %v462_v12 = vmax.f32 %v970_v7, 1e-07  ;;  %v972_v14 = vpop.eup %971  ;;  %989 = vpow2.f32 %v899_v0 }
 0x102   :  { %v486_v15 = vadd.f32 %v485_v8, %v1286_v63  ;;  %v1299_v17 = vmin.f32 %v454_v9, 0.9999999  ;;  %991 = vrcp.f32 %v406_v4 }
 0x103   :  { %v974_v18 = vpop.eup %973  ;;  %v534_v19 = vadd.f32 %v533_v11, %v1289_v3  ;;  %v1304_v20 = vmin.f32 %v462_v12, 0.9999999  ;;  %993 = vpow2.f32 %v914_v51 }
 0x104   :  { %v976_v22 = vpop.eup %975  ;;  %v487_v23 = vrot.slane %v486_v15, 2  ;;  %v491_v24 = vrot.slane %v1299_v17, 4  ;;  %v455_v25 = vmax.f32 %v974_v18, 1e-07  ;;  %995 = vpow2.f32 %v907_v13 }
 0x105   :  { %v1307_v29 = vpop.eup %977  ;;  %v535_v30 = vrot.slane %v534_v19, 2  ;;  %v539_v31 = vrot.slane %v1304_v20, 4  ;;  %v463_v32 = vmax.f32 %v976_v22, 1e-07  ;;  %997 = vpow2.f32 %v900_v21 }
 0x106   :  { %v1310_v33 = vpop.eup %979  ;;  %v488_v35 = vadd.f32 %v487_v23, %v486_v15  ;;  %v492_v36 = vadd.f32 %v491_v24, %v1299_v17  ;;  %v1313_v39 = vmin.f32 %v455_v25, 0.9999999  ;;  %v414_v18 = vadd.f32 1.0, %v972_v14 }
 0x107   :  { %v982_v40 = vpop.eup %981  ;;  %v536_v41 = vadd.f32 %v535_v30, %v534_v19  ;;  %v540_v44 = vadd.f32 %v539_v31, %v1304_v20  ;;  %v1316_v46 = vmin.f32 %v463_v32, 0.9999999  ;;  %v199_v14 = vadd.f32 %v1259_v26, %v1244_v37 }
 0x108   :  { %v984_v47 = vpop.eup %983  ;;  %v489_v48 = vrot.slane %v488_v35, 1  ;;  %v493_v49 = vrot.slane %v492_v36, 2  ;;  %v497_v50 = vrot.slane %v1313_v39, 4  ;;  %v456_v51 = vmax.f32 %v982_v40, 1e-07 }
 0x109   :  { %v537_v54 = vrot.slane %v536_v41, 1  ;;  %v541_v55 = vrot.slane %v540_v44, 2  ;;  %v545_v56 = vrot.slane %v1316_v46, 4  ;;  %v320_v59 = vadd.f32 1.0, %v984_v47  ;;  %v1320_v60 = vpop.eup %985 }
 0x10a   :  { %v1322_v61 = vadd.f32 %v489_v48, %v488_v35  ;;  %v494_v0 = vadd.f32 %v493_v49, %v492_v36  ;;  %v498_v1 = vadd.f32 %v497_v50, %v1313_v39  ;;  %v1325_v2 = vmin.f32 %v456_v51, 0.9999999  ;;  %v1327_v4 = vpop.eup %987 }
 0x10b   :  { %v1329_v6 = vadd.f32 %v537_v54, %v536_v41  ;;  %v542_v7 = vadd.f32 %v541_v55, %v540_v44  ;;  %v546_v8 = vadd.f32 %v545_v56, %v1316_v46  ;;  %999 = vrcp.f32 %v320_v59  ;;  %v990_v9 = vpop.eup %989 }
 0x10c   :  { %1001 = vrcp.f32 %v1322_v61  ;;  %v495_v10 = vrot.slane %v494_v0, 1  ;;  %v499_v11 = vrot.slane %v498_v1, 2  ;;  %v503_v12 = vrot.slane %v1325_v2, 4  ;;  %v1334_v13 = vpop.eup %991 }
 0x10d   :  { %1003 = vrcp.f32 %v1329_v6  ;;  %v543_v15 = vrot.slane %v542_v7, 1  ;;  %v547_v19 = vrot.slane %v546_v8, 2  ;;  %v994_v24 = vpop.eup %993  ;;  %v313_v31 = vadd.f32 1.0, %v990_v9 }
 0x10e   :  { %v1337_v21 = vadd.f32 %v495_v10, %v494_v0  ;;  %v500_v22 = vadd.f32 %v499_v11, %v498_v1  ;;  %v504_v23 = vadd.f32 %v503_v12, %v1325_v2  ;;  %1005 = vpow2.f32 %v908_v27  ;;  %v996_v32 = vpop.eup %995 }
 0x10f   :  { %v1340_v25 = vadd.f32 %v543_v15, %v542_v7  ;;  %v548_v30 = vadd.f32 %v547_v19, %v546_v8  ;;  %1007 = vpow2.f32 %v1275_v52  ;;  %v998_v40 = vpop.eup %997  ;;  %v247_v27 = vadd.f32 %v1261_v28, %v1244_v37 }
 0x110   :  { %1009 = vrcp.f32 %v1337_v21  ;;  %v501_v35 = vrot.slane %v500_v22, 1  ;;  %v505_v36 = vrot.slane %v504_v23, 2  ;;  %v203_v44 = vadd.f32 %v1266_v38, %v1242_v34 }
 0x111   :  { %1011 = vrcp.f32 %v1340_v25  ;;  %v549_v41 = vrot.slane %v548_v30, 1  ;;  %v407_v47 = vadd.f32 1.0, %v1307_v29  ;;  %v415_v26 = vadd.f32 1.0, %v1310_v33 }
 0x112   :  { %1013 = vrcp.f32 %v414_v18  ;;  %v1351_v52 = vadd.f32 %v501_v35, %v500_v22  ;;  %v506_v48 = vadd.f32 %v505_v36, %v504_v23  ;;  %v251_v50 = vadd.f32 %v1268_v42, %v1242_v34 }
 0x113   :  { %v1354_v49 = vadd.f32 %v549_v41, %v548_v30  ;;  %1015 = vrcp.f32 %v313_v31  ;;  %v923_v51 = vmul.f32 -1.442695, %v1292_v5  ;;  %v1361_v38 = vmul.f32 -1.442695, %v199_v14 }
 0x114   :  { %1017 = vrcp.f32 %v1351_v52  ;;  %v507_v28 = vrot.slane %v506_v48, 1  ;;  %v1364_v29 = vmul.f32 -1.442695, %v247_v27  ;;  %v1366_v55 = vmul.f32 -1.442695, %v203_v44 }
 0x115   :  { %v1000_v54 = vpop.eup %999  ;;  %1019 = vrcp.f32 %v1354_v49  ;;  %v209_v33 = vadd.f32 %v1277_v53, %v1242_v34  ;;  %v257_v5 = vadd.f32 %v1279_v57, %v1242_v34  ;;  %v408_v7 = vadd.f32 1.0, %v994_v24 }
 0x116   :  { %v1002_v56 = vpop.eup %1001  ;;  %1021 = vrcp.f32 %v407_v47  ;;  %v1370_v42 = vadd.f32 %v507_v28, %v506_v48  ;;  %v464_v59 = vmax.f32 %v1000_v54, 1e-07  ;;  %v1375_v8 = vmul.f32 -1.442695, %v251_v50 }
 0x117   :  { %v1004_v0 = vpop.eup %1003  ;;  %v597_v1 = vmul.f32 %v1002_v56, %v1322_v61  ;;  %1023 = vrcp.f32 %v415_v26  ;;  %v321_v11 = vadd.f32 1.0, %v996_v32  ;;  %v314_v34 = vadd.f32 1.0, %v998_v40 }
 0x118   :  { %v1006_v9 = vpop.eup %1005  ;;  %v605_v10 = vmul.f32 %v1004_v0, %v1329_v6  ;;  %1025 = vrcp.f32 %v1370_v42  ;;  %v1379_v53 = vmin.f32 %v464_v59, 0.9999999  ;;  %v1382_v57 = vmul.f32 -1.442695, %v209_v33 }
 0x119   :  { %v1008_v12 = vpop.eup %1007  ;;  %v613_v15 = vsub.f32 2.0, %v597_v1  ;;  %1027 = vpow2.f32 %v1301_v16  ;;  %v1385_v23 = vmul.f32 -1.442695, %v257_v5  ;;  %v322_v32 = vadd.f32 1.0, %v1006_v9 }
 0x11a   :  { %v1010_v18 = vpop.eup %1009  ;;  %v621_v19 = vsub.f32 2.0, %v605_v10  ;;  %v551_v22 = vrot.slane %v1379_v53, 4  ;;  %1029 = vpow2.f32 %v923_v51  ;;  %v1393_v44 = vadd.f32 1.0, %v1008_v12 }
 0x11b   :  { %v1012_v24 = vpop.eup %1011  ;;  %v629_v30 = vmul.f32 %v1002_v56, %v613_v15  ;;  %v598_v31 = vmul.f32 %v1010_v18, %v1337_v21  ;;  %1031 = vrcp.f32 %v408_v7 }
 0x11c   :  { %v1388_v35 = vpop.eup %1013  ;;  %v637_v36 = vmul.f32 %v1004_v0, %v621_v19  ;;  %v606_v16 = vmul.f32 %v1012_v24, %v1340_v25  ;;  %v552_v14 = vadd.f32 %v551_v22, %v1379_v53  ;;  %1033 = vrcp.f32 %v321_v11 }
 0x11d   :  { %v1016_v40 = vpop.eup %1015  ;;  %v645_v41 = vmul.f32 %v629_v30, %v1322_v61  ;;  %v614_v27 = vsub.f32 2.0, %v598_v31  ;;  %1035 = vrcp.f32 %v314_v34 }
 0x11e   :  { %v1018_v47 = vpop.eup %1017  ;;  %v653_v48 = vmul.f32 %v637_v36, %v1329_v6  ;;  %v622_v26 = vsub.f32 2.0, %v606_v16  ;;  %v553_v50 = vrot.slane %v552_v14, 2  ;;  %v457_v28 = vmax.f32 %v1016_v40, 1e-07 }
 0x11f   :  { %v1020_v51 = vpop.eup %1019  ;;  %v661_v54 = vsub.f32 2.0, %v645_v41  ;;  %v630_v33 = vmul.f32 %v1010_v18, %v614_v27  ;;  %v599_v56 = vmul.f32 %v1018_v47, %v1351_v52  ;;  %1037 = vrcp.f32 %v322_v32 }
 0x120   :  { %v1022_v59 = vpop.eup %1021  ;;  %v669_v5 = vsub.f32 2.0, %v653_v48  ;;  %v638_v0 = vmul.f32 %v1012_v24, %v622_v26  ;;  %v607_v61 = vmul.f32 %v1020_v51, %v1354_v49  ;;  %v554_v1 = vadd.f32 %v553_v50, %v552_v14 }
 0x121   :  { %v1024_v7 = vpop.eup %1023  ;;  %v677_v9 = vmul.f32 %v661_v54, %v629_v30  ;;  %v646_v10 = vmul.f32 %v630_v33, %v1337_v21  ;;  %v615_v6 = vsub.f32 2.0, %v599_v56  ;;  %v1399_v11 = vmin.f32 %v457_v28, 0.9999999 }
 0x122   :  { %v1026_v12 = vpop.eup %1025  ;;  %v685_v15 = vmul.f32 %v669_v5, %v637_v36  ;;  %v654_v34 = vmul.f32 %v638_v0, %v1340_v25  ;;  %v623_v18 = vsub.f32 2.0, %v607_v61  ;;  %v555_v19 = vrot.slane %v554_v1, 1 }
 0x123   :  { %v1028_v22 = vpop.eup %1027  ;;  %v693_v31 = vmul.f32 %v677_v9, %v1286_v63  ;;  %v662_v24 = vsub.f32 2.0, %v646_v10  ;;  %v631_v32 = vmul.f32 %v1018_v47, %v615_v6  ;;  %v600_v16 = vmul.f32 %v1026_v12, %v1370_v42 }
 0x124   :  { %v1404_v14 = vpop.eup %1029  ;;  %v701_v21 = vmul.f32 %v685_v15, %v1289_v3  ;;  %v670_v30 = vsub.f32 2.0, %v654_v34  ;;  %v639_v40 = vmul.f32 %v1020_v51, %v623_v18  ;;  %v1407_v41 = vadd.f32 %v555_v19, %v554_v1 }
 0x125   :  { %v1032_v36 = vpop.eup %1031  ;;  %v709_v25 = vmul.f32 %v1320_v60, %v693_v31  ;;  %v678_v27 = vmul.f32 %v662_v24, %v630_v33  ;;  %v647_v48 = vmul.f32 %v631_v32, %v1351_v52  ;;  %v616_v26 = vsub.f32 2.0, %v600_v16 }
 0x126   :  { %v1411_v63 = vpop.eup %1033  ;;  %v717_v47 = vmul.f32 %v1327_v4, %v701_v21  ;;  %v686_v50 = vmul.f32 %v670_v30, %v638_v0  ;;  %v655_v28 = vmul.f32 %v639_v40, %v1354_v49  ;;  %1039 = vrcp.f32 %v1407_v41 }
 0x127   :  { %v1416_v3 = vpop.eup %1035  ;;  %v725_v51 = vrot.slane %v709_v25, 4  ;;  %v694_v54 = vmul.f32 %v678_v27, %v1299_v17  ;;  %v663_v56 = vsub.f32 2.0, %v647_v48  ;;  %v632_v60 = vmul.f32 %v1026_v12, %v616_v26 }
 0x128   :  { %v773_v33 = vrot.slane %v717_v47, 4  ;;  %v702_v52 = vmul.f32 %v686_v50, %v1304_v20  ;;  %v671_v5 = vsub.f32 2.0, %v655_v28  ;;  %v509_v61 = vrot.slane %v1399_v11, 4 }
 0x129   :  { %v1421_v1 = vpop.eup %1037  ;;  %v726_v4 = vadd.f32 %v725_v51, %v709_v25  ;;  %v710_v49 = vmul.f32 %v1334_v13, %v694_v54  ;;  %v679_v0 = vmul.f32 %v663_v56, %v631_v32  ;;  %v648_v9 = vmul.f32 %v632_v60, %v1370_v42 }
 0x12a   :  { %v774_v10 = vadd.f32 %v773_v33, %v717_v47  ;;  %v718_v6 = vmul.f32 %v1388_v35, %v702_v52  ;;  %v687_v17 = vmul.f32 %v671_v5, %v639_v40  ;;  %v510_v12 = vadd.f32 %v509_v61, %v1399_v11 }
 0x12b   :  { %v727_v15 = vrot.slane %v726_v4, 2  ;;  %v731_v34 = vrot.slane %v710_v49, 4  ;;  %v695_v20 = vmul.f32 %v679_v0, %v1313_v39  ;;  %v664_v18 = vsub.f32 2.0, %v648_v9 }
 0x12c   :  { %v775_v19 = vrot.slane %v774_v10, 2  ;;  %v779_v31 = vrot.slane %v718_v6, 4  ;;  %v703_v24 = vmul.f32 %v687_v17, %v1316_v46  ;;  %v511_v16 = vrot.slane %v510_v12, 2 }
 0x12d   :  { %v732_v13 = vadd.f32 %v731_v34, %v710_v49  ;;  %v711_v32 = vmul.f32 %v1022_v59, %v695_v20  ;;  %v680_v21 = vmul.f32 %v664_v18, %v632_v60  ;;  %1041 = vpow2.f32 %v1366_v55 }
 0x12e   :  { %v728_v42 = vadd.f32 %v727_v15, %v726_v4  ;;  %v780_v35 = vadd.f32 %v779_v31, %v718_v6  ;;  %v719_v30 = vmul.f32 %v1024_v7, %v703_v24  ;;  %v512_v40 = vadd.f32 %v511_v16, %v510_v12 }
 0x12f   :  { %v776_v25 = vadd.f32 %v775_v19, %v774_v10  ;;  %v733_v27 = vrot.slane %v732_v13, 2  ;;  %v737_v48 = vrot.slane %v711_v32, 4  ;;  %v696_v39 = vmul.f32 %v680_v21, %v1325_v2 }
 0x130   :  { %v1040_v26 = vpop.eup %1039  ;;  %v785_v47 = vrot.slane %v719_v30, 4  ;;  %v513_v50 = vrot.slane %v512_v40, 1  ;;  %v1431_v28 = vadd.f32 1.0, %v1028_v22  ;;  %1043 = vpow2.f32 %v1361_v38 }
 0x131   :  { %v734_v46 = vadd.f32 %v733_v27, %v732_v13  ;;  %v781_v59 = vrot.slane %v780_v35, 2  ;;  %v738_v51 = vadd.f32 %v737_v48, %v711_v32  ;;  %v608_v55 = vmul.f32 %v1040_v26, %v1407_v41 }
 0x132   :  { %v729_v7 = vrot.slane %v728_v42, 1  ;;  %v786_v54 = vadd.f32 %v785_v47, %v719_v30  ;;  %v712_v56 = vmul.f32 %v1032_v36, %v696_v39  ;;  %1045 = vrcp.f32 %v1393_v44 }
 0x133   :  { %v777_v60 = vrot.slane %v776_v25, 1  ;;  %v739_v2 = vrot.slane %v738_v51, 2  ;;  %v624_v33 = vsub.f32 2.0, %v608_v55  ;;  %v1436_v52 = vadd.f32 %v513_v50, %v512_v40 }
 0x134   :  { %v735_v22 = vrot.slane %v734_v46, 1  ;;  %v787_v5 = vrot.slane %v786_v54, 2  ;;  %v743_v38 = vrot.slane %v712_v56, 4  ;;  %v465_v61 = vmax.f32 %v1411_v63, 1e-07 }
 0x135   :  { %v782_v4 = vadd.f32 %v781_v59, %v780_v35  ;;  %v740_v49 = vadd.f32 %v739_v2, %v738_v51  ;;  %v640_v0 = vmul.f32 %v1040_v26, %v624_v33  ;;  %1047 = vrcp.f32 %v1436_v52 }
 0x136   :  { %v730_v36 = vadd.f32 %v729_v7, %v728_v42  ;;  %v788_v9 = vadd.f32 %v787_v5, %v786_v54  ;;  %v744_v44 = vadd.f32 %v743_v38, %v712_v56  ;;  %v1440_v10 = vmin.f32 %v465_v61, 0.9999999 }
 0x137   :  { %v1042_v6 = vpop.eup %1041  ;;  %v741_v17 = vrot.slane %v740_v49, 1  ;;  %v656_v12 = vmul.f32 %v640_v0, %v1407_v41  ;;  %v458_v15 = vmax.f32 %v1416_v3, 1e-07  ;;  %v466_v34 = vmax.f32 %v1421_v1, 1e-07 }
 0x138   :  { %v778_v63 = vadd.f32 %v777_v60, %v776_v25  ;;  %v736_v20 = vadd.f32 %v735_v22, %v734_v46  ;;  %v745_v18 = vrot.slane %v744_v44, 2  ;;  %v557_v19 = vrot.slane %v1440_v10, 4 }
 0x139   :  { %v783_v31 = vrot.slane %v782_v4, 1  ;;  %v672_v24 = vsub.f32 2.0, %v656_v12  ;;  %v1446_v16 = vmin.f32 %v458_v15, 0.9999999  ;;  %v1448_v13 = vmin.f32 %v466_v34, 0.9999999 }
 0x13a   :  { %v1450_v32 = vpop.eup %1043  ;;  %v742_v21 = vadd.f32 %v741_v17, %v740_v49  ;;  %v789_v42 = vrot.slane %v788_v9, 1  ;;  %v746_v41 = vadd.f32 %v745_v18, %v744_v44  ;;  %v558_v3 = vadd.f32 %v557_v19, %v1440_v10 }
 0x13b   :  { %v688_v35 = vmul.f32 %v672_v24, %v640_v0  ;;  %v515_v1 = vrot.slane %v1446_v16, 4  ;;  %v563_v30 = vrot.slane %v1448_v13, 4  ;;  %v315_v40 = vadd.f32 1.0, %v1042_v6 }
 0x13c   :  { %v1046_v25 = vpop.eup %1045  ;;  %v747_v27 = vrot.slane %v746_v41, 1  ;;  %v559_v48 = vrot.slane %v558_v3, 2  ;;  %1049 = vpow2.f32 %v1375_v8  ;;  %v838_v39 = vsel %vm837_vm1, %v736_v20, %v730_v36 }
 0x13d   :  { %v704_v26 = vmul.f32 %v688_v35, %v1379_v53  ;;  %v516_v47 = vadd.f32 %v515_v1, %v1446_v16  ;;  %v564_v50 = vadd.f32 %v563_v30, %v1448_v13  ;;  %1051 = vrcp.f32 %v315_v40 }
 0x13e   :  { %v784_v46 = vadd.f32 %v783_v31, %v782_v4  ;;  %v748_v59 = vadd.f32 %v747_v27, %v746_v41  ;;  %v560_v51 = vadd.f32 %v559_v48, %v558_v3  ;;  %v840_v55 = vsel %vm839_vm2, %v742_v21, %v838_v39 }
 0x13f   :  { %v1048_v7 = vpop.eup %1047  ;;  %v790_v54 = vadd.f32 %v789_v42, %v788_v9  ;;  %v720_v56 = vmul.f32 %v1046_v25, %v704_v26  ;;  %v517_v60 = vrot.slane %v516_v47, 2  ;;  %v565_v2 = vrot.slane %v564_v50, 2 }
 0x140   :  { %v601_v8 = vmul.f32 %v1048_v7, %v1436_v52  ;;  %v561_v33 = vrot.slane %v560_v51, 1  ;;  %1053 = vpow2.f32 %v1382_v57  ;;  %v1464_v53 = vsel %vm841_vm3, %v748_v59, %v840_v55 }
 0x141   :  { %v791_v22 = vrot.slane %v720_v56, 4  ;;  %v518_v5 = vadd.f32 %v517_v60, %v516_v47  ;;  %v566_v38 = vadd.f32 %v565_v2, %v564_v50  ;;  %1055 = vpow2.f32 %v1385_v23 }
 0x142   :  { %v617_v61 = vsub.f32 2.0, %v601_v8  ;;  %v1467_v4 = vadd.f32 %v561_v33, %v560_v51  ;;  %1057 = vpow2.f32 %v1364_v29  ;;  %v851_v49 = vsel %vm837_vm1, %v784_v46, %v778_v63 }
 0x143   :  { %v792_v0 = vadd.f32 %v791_v22, %v720_v56  ;;  %1059 = vrcp.f32 %v1431_v28  ;;  %v519_v36 = vrot.slane %v518_v5, 1  ;;  %v567_v57 = vrot.slane %v566_v38, 1 }
 0x144   :  { %v633_v9 = vmul.f32 %v1048_v7, %v617_v61  ;;  %1061 = vrcp.f32 %v1467_v4  ;;  %v852_v44 = vsel %vm839_vm2, %v790_v54, %v851_v49  ;;  %v417_v40 = vadd.f32 1.0, %v1404_v14 }
 0x145   :  { %v793_v6 = vrot.slane %v792_v0, 2  ;;  %v1474_v17 = vadd.f32 %v519_v36, %v518_v5  ;;  %v1476_v23 = vadd.f32 %v567_v57, %v566_v38  ;;  %v205_v25 = vadd.f32 %v1270_v43, %v1244_v37 }
 0x146   :  { %v1050_v12 = vpop.eup %1049  ;;  %v649_v29 = vmul.f32 %v633_v9, %v1436_v52  ;;  %v410_v26 = vadd.f32 1.0, %v1450_v32  ;;  %v253_v55 = vadd.f32 %v1272_v45, %v1244_v37 }
 0x147   :  { %v1052_v15 = vpop.eup %1051  ;;  %v794_v34 = vadd.f32 %v793_v6, %v792_v0  ;;  %1063 = vrcp.f32 %v1474_v17  ;;  %v323_v28 = vadd.f32 1.0, %v1050_v12  ;;  %v917_v43 = vmul.f32 -1.442695, %v205_v25 }
 0x148   :  { %v665_v63 = vsub.f32 2.0, %v649_v29  ;;  %1065 = vrcp.f32 %v1476_v23  ;;  %v459_v20 = vmax.f32 %v1052_v15, 1e-07  ;;  %v925_v45 = vmul.f32 -1.442695, %v253_v55 }
 0x149   :  { %v795_v18 = vrot.slane %v794_v34, 1  ;;  %1067 = vrcp.f32 %v323_v28  ;;  %v211_v29 = vadd.f32 %v1281_v58, %v1244_v37  ;;  %v259_v58 = vadd.f32 %v1284_v62, %v1244_v37 }
 0x14a   :  { %v1054_v19 = vpop.eup %1053  ;;  %v681_v31 = vmul.f32 %v665_v63, %v633_v9  ;;  %v1481_v24 = vmin.f32 %v459_v20, 0.9999999 }
 0x14b   :  { %v1056_v21 = vpop.eup %1055  ;;  %v796_v42 = vadd.f32 %v795_v18, %v794_v34  ;;  %v316_v41 = vadd.f32 1.0, %v1054_v19 }
 0x14c   :  { %v1058_v3 = vpop.eup %1057  ;;  %v697_v52 = vmul.f32 %v681_v31, %v1399_v11  ;;  %v521_v35 = vrot.slane %v1481_v24, 4  ;;  %v324_v1 = vadd.f32 1.0, %v1056_v21 }
 0x14d   :  { %v1060_v30 = vpop.eup %1059  ;;  %1069 = vrcp.f32 %v316_v41  ;;  %v1489_v27 = vsel %vm841_vm3, %v796_v42, %v852_v44  ;;  %v418_v50 = vadd.f32 1.0, %v1058_v3 }
 0x14e   :  { %v1062_v48 = vpop.eup %1061  ;;  %v713_v39 = vmul.f32 %v1060_v30, %v697_v52  ;;  %v522_v47 = vadd.f32 %v521_v35, %v1481_v24  ;;  %1071 = vrcp.f32 %v324_v1 }
 0x14f   :  { %v609_v11 = vmul.f32 %v1062_v48, %v1467_v4  ;;  %1073 = vrcp.f32 %v417_v40  ;;  %v918_v40 = vmul.f32 -1.442695, %v211_v29 }
 0x150   :  { %v749_v46 = vrot.slane %v713_v39, 4  ;;  %v523_v59 = vrot.slane %v522_v47, 2  ;;  %1075 = vrcp.f32 %v410_v26 }
 0x151   :  { %v1064_v14 = vpop.eup %1063  ;;  %v625_v51 = vsub.f32 2.0, %v609_v11  ;;  %1077 = vrcp.f32 %v418_v50  ;;  %v926_v11 = vmul.f32 -1.442695, %v259_v58 }
 0x152   :  { %v1066_v7 = vpop.eup %1065  ;;  %v750_v54 = vadd.f32 %v749_v46, %v713_v39  ;;  %v602_v56 = vmul.f32 %v1064_v14, %v1474_v17  ;;  %v524_v32 = vadd.f32 %v523_v59, %v522_v47  ;;  %1079 = vpow2.f32 %v917_v43 }
 0x153   :  { %v1068_v60 = vpop.eup %1067  ;;  %v641_v2 = vmul.f32 %v1062_v48, %v625_v51  ;;  %v610_v8 = vmul.f32 %v1066_v7, %v1476_v23 }
 0x154   :  { %v751_v33 = vrot.slane %v750_v54, 2  ;;  %v618_v22 = vsub.f32 2.0, %v602_v56  ;;  %v525_v5 = vrot.slane %v524_v32, 1  ;;  %v467_v38 = vmax.f32 %v1068_v60, 1e-07 }
 0x155   :  { %v657_v61 = vmul.f32 %v641_v2, %v1467_v4  ;;  %v626_v49 = vsub.f32 2.0, %v610_v8 }
 0x156   :  { %v752_v0 = vadd.f32 %v751_v33, %v750_v54  ;;  %v634_v36 = vmul.f32 %v1064_v14, %v618_v22  ;;  %v1499_v57 = vadd.f32 %v525_v5, %v524_v32  ;;  %v1501_v9 = vmin.f32 %v467_v38, 0.9999999 }
 0x157   :  { %v1070_v44 = vpop.eup %1069  ;;  %v673_v6 = vsub.f32 2.0, %v657_v61  ;;  %v642_v12 = vmul.f32 %v1066_v7, %v626_v49 }
 0x158   :  { %v1072_v15 = vpop.eup %1071  ;;  %v753_v34 = vrot.slane %v752_v0, 1  ;;  %v650_v4 = vmul.f32 %v634_v36, %v1474_v17  ;;  %1081 = vrcp.f32 %v1499_v57  ;;  %v569_v28 = vrot.slane %v1501_v9, 4 }
 0x159   :  { %v689_v63 = vmul.f32 %v673_v6, %v641_v2  ;;  %v658_v20 = vmul.f32 %v642_v12, %v1476_v23  ;;  %v460_v18 = vmax.f32 %v1070_v44, 1e-07  ;;  %v468_v19 = vmax.f32 %v1072_v15, 1e-07  ;;  %v1074_v41 = vpop.eup %1073 }
 0x15a   :  { %v666_v31 = vsub.f32 2.0, %v650_v4  ;;  %v570_v21 = vadd.f32 %v569_v28, %v1501_v9  ;;  %v754_v42 = vadd.f32 %v753_v34, %v752_v0  ;;  %v1076_v1 = vpop.eup %1075  ;;  %1083 = vpow2.f32 %v925_v45 }
 0x15b   :  { %v705_v3 = vmul.f32 %v689_v63, %v1440_v10  ;;  %v674_v17 = vsub.f32 2.0, %v658_v20  ;;  %v1513_v52 = vmin.f32 %v460_v18, 0.9999999  ;;  %v1515_v35 = vmin.f32 %v468_v19, 0.9999999  ;;  %v1078_v48 = vpop.eup %1077 }
 0x15c   :  { %v682_v30 = vmul.f32 %v666_v31, %v634_v36  ;;  %v571_v23 = vrot.slane %v570_v21, 2  ;;  %v1519_v25 = vsel %vm843_vm4, %v754_v42, %v1464_v53  ;;  %v1080_v50 = vpop.eup %1079  ;;  %1085 = vpow2.f32 %v918_v40 }
 0x15d   :  { %v721_v39 = vmul.f32 %v1074_v41, %v705_v3  ;;  %v690_v37 = vmul.f32 %v674_v17, %v642_v12  ;;  %v527_v62 = vrot.slane %v1513_v52, 4  ;;  %v575_v10 = vrot.slane %v1515_v35, 4 }
 0x15e   :  { %v698_v26 = vmul.f32 %v682_v30, %v1446_v16  ;;  %v572_v47 = vadd.f32 %v571_v23, %v570_v21  ;;  %v411_v2 = vadd.f32 1.0, %v1080_v50  ;;  %1087 = vpow2.f32 %v926_v11 }
 0x15f   :  { %v797_v46 = vrot.slane %v721_v39, 4  ;;  %v706_v59 = vmul.f32 %v690_v37, %v1448_v13  ;;  %v528_v14 = vadd.f32 %v527_v62, %v1513_v52  ;;  %v576_v53 = vadd.f32 %v575_v10, %v1515_v35 }
 0x160   :  { %v714_v51 = vmul.f32 %v1076_v1, %v698_v26  ;;  %v573_v43 = vrot.slane %v572_v47, 1 }
 0x161   :  { %v798_v55 = vadd.f32 %v797_v46, %v721_v39  ;;  %v722_v7 = vmul.f32 %v1078_v48, %v706_v59  ;;  %v529_v54 = vrot.slane %v528_v14, 2  ;;  %v577_v56 = vrot.slane %v576_v53, 2 }
 0x162   :  { %v1082_v32 = vpop.eup %1081  ;;  %v755_v16 = vrot.slane %v714_v51, 4  ;;  %v574_v60 = vadd.f32 %v573_v43, %v572_v47 }
 0x163   :  { %v799_v8 = vrot.slane %v798_v55, 2  ;;  %v803_v33 = vrot.slane %v722_v7, 4  ;;  %v603_v13 = vmul.f32 %v1082_v32, %v1499_v57  ;;  %v530_v22 = vadd.f32 %v529_v54, %v528_v14 }
 0x164   :  { %v756_v5 = vadd.f32 %v755_v16, %v714_v51  ;;  %1089 = vrcp.f32 %v574_v60  ;;  %v578_v38 = vadd.f32 %v577_v56, %v576_v53  ;;  %v1084_v34 = vpop.eup %1083 }
 0x165   :  { %v800_v61 = vadd.f32 %v799_v8, %v798_v55  ;;  %v804_v49 = vadd.f32 %v803_v33, %v722_v7  ;;  %v619_v45 = vsub.f32 2.0, %v603_v13  ;;  %v531_v0 = vrot.slane %v530_v22, 1 }
 0x166   :  { %v757_v36 = vrot.slane %v756_v5, 2  ;;  %1091 = vrcp.f32 %v411_v2  ;;  %v579_v44 = vrot.slane %v578_v38, 1  ;;  %v1086_v19 = vpop.eup %1085  ;;  %v419_v23 = vadd.f32 1.0, %v1084_v34 }
 0x167   :  { %v801_v6 = vrot.slane %v800_v61, 1  ;;  %v805_v12 = vrot.slane %v804_v49, 2  ;;  %v635_v29 = vmul.f32 %v1082_v32, %v619_v45  ;;  %v532_v15 = vadd.f32 %v531_v0, %v530_v22 }
 0x168   :  { %v758_v4 = vadd.f32 %v757_v36, %v756_v5  ;;  %v580_v28 = vadd.f32 %v579_v44, %v578_v38  ;;  %v1088_v41 = vpop.eup %1087 }
 0x169   :  { %v806_v63 = vadd.f32 %v805_v12, %v804_v49  ;;  %v651_v20 = vmul.f32 %v635_v29, %v1499_v57  ;;  %1093 = vrcp.f32 %v532_v15  ;;  %v802_v18 = vadd.f32 %v801_v6, %v800_v61 }
 0x16a   :  { %1095 = vrcp.f32 %v580_v28  ;;  %v759_v31 = vrot.slane %v758_v4, 1  ;;  %v420_v59 = vadd.f32 1.0, %v1088_v41 }
 0x16b   :  { %v667_v21 = vsub.f32 2.0, %v651_v20  ;;  %v807_v58 = vrot.slane %v806_v63, 1  ;;  %v854_v42 = vsel %vm843_vm4, %v802_v18, %v1489_v27  ;;  %1097 = vrcp.f32 %v419_v23 }
 0x16c   :  { %v760_v3 = vadd.f32 %v759_v31, %v758_v4  ;;  %v412_v27 = vadd.f32 1.0, %v1086_v19 }
 0x16d   :  { %v683_v17 = vmul.f32 %v667_v21, %v635_v29  ;;  %v808_v1 = vadd.f32 %v807_v58, %v806_v63 }
 0x16e   :  { %v1090_v30 = vpop.eup %1089  ;;  %v846_v40 = vsel %vm845_vm5, %v760_v3, %v1519_v25  ;;  %1099 = vrcp.f32 %v412_v27 }
 0x16f   :  { %v699_v57 = vmul.f32 %v683_v17, %v1481_v24  ;;  %v611_v48 = vmul.f32 %v1090_v30, %v574_v60  ;;  %v855_v39 = vsel %vm845_vm5, %v808_v1, %v854_v42  ;;  %1101 = vrcp.f32 %v420_v59 }
 0x170   :  { %v1092_v37 = vpop.eup %1091 }
 0x171   :  { %v627_v62 = vsub.f32 2.0, %v611_v48  ;;  %v715_v10 = vmul.f32 %v1092_v37, %v699_v57 }
 0x173   :  { %v1094_v26 = vpop.eup %1093  ;;  %v643_v47 = vmul.f32 %v1090_v30, %v627_v62  ;;  %v761_v11 = vrot.slane %v715_v10, 4 }
 0x174   :  { %v1096_v50 = vpop.eup %1095  ;;  %v604_v46 = vmul.f32 %v1094_v26, %v532_v15 }
 0x175   :  { %v659_v14 = vmul.f32 %v643_v47, %v574_v60  ;;  %v762_v53 = vadd.f32 %v761_v11, %v715_v10  ;;  %v612_v51 = vmul.f32 %v1096_v50, %v580_v28  ;;  %v1098_v13 = vpop.eup %1097 }
 0x176   :  { %v620_v43 = vsub.f32 2.0, %v604_v46 }
 0x177   :  { %v675_v25 = vsub.f32 2.0, %v659_v14  ;;  %v763_v55 = vrot.slane %v762_v53, 2  ;;  %v628_v24 = vsub.f32 2.0, %v612_v51 }
 0x178   :  { %v636_v7 = vmul.f32 %v1094_v26, %v620_v43  ;;  %v1100_v44 = vpop.eup %1099 }
 0x179   :  { %v691_v54 = vmul.f32 %v675_v25, %v643_v47  ;;  %v644_v56 = vmul.f32 %v1096_v50, %v628_v24  ;;  %v764_v32 = vadd.f32 %v763_v55, %v762_v53 }
 0x17a   :  { %v652_v16 = vmul.f32 %v636_v7, %v532_v15 }
 0x17b   :  { %v707_v2 = vmul.f32 %v691_v54, %v1501_v9  ;;  %v660_v8 = vmul.f32 %v644_v56, %v580_v28  ;;  %v765_v33 = vrot.slane %v764_v32, 1  ;;  %v1102_v9 = vpop.eup %1101 }
 0x17c   :  { %v668_v22 = vsub.f32 2.0, %v652_v16 }
 0x17d   :  { %v723_v60 = vmul.f32 %v1098_v13, %v707_v2  ;;  %v676_v5 = vsub.f32 2.0, %v660_v8  ;;  %v766_v38 = vadd.f32 %v765_v33, %v764_v32 }
 0x17e   :  { %v684_v61 = vmul.f32 %v668_v22, %v636_v7 }
 0x17f   :  { %v809_v49 = vrot.slane %v723_v60, 4  ;;  %v692_v45 = vmul.f32 %v676_v5, %v644_v56  ;;  %v848_v0 = vsel %vm847_vm6, %v766_v38, %v846_v40 }
 0x180   :  { %v700_v36 = vmul.f32 %v684_v61, %v1513_v52 }
 0x181   :  { %v810_v6 = vadd.f32 %v809_v49, %v723_v60  ;;  %v708_v12 = vmul.f32 %v692_v45, %v1515_v35 }
 0x182   :  { %v716_v29 = vmul.f32 %v1100_v44, %v700_v36 }
 0x183   :  { %v811_v15 = vrot.slane %v810_v6, 2  ;;  %v724_v34 = vmul.f32 %v1102_v9, %v708_v12 }
 0x184   :  { %v767_v4 = vrot.slane %v716_v29, 4 }
 0x185   :  { %v815_v28 = vrot.slane %v724_v34, 4  ;;  %v812_v63 = vadd.f32 %v811_v15, %v810_v6 }
 0x186   :  { %v768_v20 = vadd.f32 %v767_v4, %v716_v29 }
 0x187   :  { %v816_v18 = vadd.f32 %v815_v28, %v724_v34  ;;  %v813_v19 = vrot.slane %v812_v63, 1 }
 0x188   :  { %v769_v31 = vrot.slane %v768_v20, 2 }
 0x189   :  { %v814_v21 = vadd.f32 %v813_v19, %v812_v63  ;;  %v817_v58 = vrot.slane %v816_v18, 2 }
 0x18a   :  { %v770_v42 = vadd.f32 %v769_v31, %v768_v20 }
 0x18b   :  { %v818_v41 = vadd.f32 %v817_v58, %v816_v18  ;;  %v856_v52 = vsel %vm847_vm6, %v814_v21, %v855_v39 }
 0x18c   :  { %v771_v3 = vrot.slane %v770_v42, 1 }
 0x18d   :  { %v819_v35 = vrot.slane %v818_v41, 1 }
 0x18e   :  { %v772_v17 = vadd.f32 %v771_v3, %v770_v42 }
 0x18f   :  { %v820_v1 = vadd.f32 %v819_v35, %v818_v41 }
 0x190   :  { %v850_v30 = vsel %vm849_vm7, %v772_v17, %v848_v0 }
 0x191   :  { %v857_v23 = vsel %vm849_vm7, %v820_v1, %v856_v52  ;;  %861 = vst.msk [vmem:[#allocation2] sm:$0xff] %vm860_vm8, %v850_v30 }
 0x192   :  { %862 = vst.msk [vmem:[#allocation2 + $0x8] sm:$0xff] %vm860_vm8, %v857_v23 }
 0x193   :  { %1114 = shalt.err (!%p1111_p4)
}
 0x194   :  { %s1115_s9 = scalar_lea.hbm %s1553_s3, 256 }
 0x195   :  { %p1116_p5 = scmp.ne.s32.totalorder %s1553_s3, %s1115_s9  ;;  %p1119_p6 = scmp.lt.u32.totalorder %s1115_s9, %s1553_s3 }
 0x197   :  { %p1121_p7 = pnand %p1119_p6, %p1116_p5 }
 0x199   :  { %1124 = shalt.err (!%p1121_p7)
}
 0x19a   :  { %s1129_s14 = smov 128   ;;  %s1130_s15 = smov 8  }
 0x19b   :  { %874 = dma.vmem_to_hbm [thread:$0]  %s869_s2, 256, %s1553_s3, [#allocation3], %s1129_s14, %s1129_s14, %s1130_s15  }
 0x19c   :  { %1125 = dma.done.wait [#allocation3], 256  }
 0x19d   :  { %1126 = vsyncadd [#allocation3], 4294967040 }
 0x19e   :  { %878 = vsyncpa [#allocation3], 1 }

</bundles_post_ra>
